<compile_context>
chip_gen: v5e
topology: v5e:2x2
jax: 0.10.0
libtpu: 0.0.40
codegen_flags: <defaults>
</compile_context>

<pallas_src>
import jax
import jax.numpy as jnp
from jax import lax
from jax.experimental import pallas as pl
from jax.experimental.pallas import tpu as pltpu


def rnn_fc_kernel(x_ref, wih_ref, whh_ref, b_ref, wfc_ref, bfc_ref,
                  out_ref, xw_ref):
    TB = x_ref.shape[0]          # T * B_blk (time-major rows for this batch block)
    Bb = out_ref.shape[0]        # batch rows handled by this grid program
    H = whh_ref.shape[0]
    T = TB // Bb

    # --- Prologue: batched input projection for every timestep (one MXU matmul).
    xw_ref[...] = (
        jnp.dot(x_ref[...], wih_ref[...], preferred_element_type=jnp.float32)
        + b_ref[...]                                   # combined b_ih + b_hh
    )

    whh = whh_ref[...]                                 # keep W_hh^T resident (bf16)

    # --- Sequential recurrence: only (Bb,H)@(H,H) + tanh is on the serial path.
    def step(t, h_prev):
        row = pl.multiple_of(t * Bb, 8)
        pre = xw_ref[pl.ds(row, Bb), :] + jnp.dot(
            h_prev.astype(jnp.bfloat16), whh,
            preferred_element_type=jnp.float32)
        return jnp.tanh(pre)                           # f32 hidden state

    h_last = lax.fori_loop(0, T, step, jnp.zeros((Bb, H), jnp.float32),
                           unroll=min(T, 8))           # bounded unroll

    # --- Epilogue: one-shot bf16 FC into a lane-dense (Bb, 128-padded) block.
    out_ref[...] = (
        jnp.dot(h_last.astype(jnp.bfloat16), wfc_ref[...],
                preferred_element_type=jnp.float32)
        + bfc_ref[...]
    )


def _round_up(v, m):
    return (v + m - 1) // m * m


def rnn_model_forward(x_btd, w_ih, w_hh, b_ih, b_hh, w_fc, b_fc):
    """Forward pass of RNNModel. x_btd: (B, T, D_in), batch_first like PyTorch."""
    B, T, D_in = x_btd.shape
    H = w_ih.shape[0]
    C = w_fc.shape[0]

    D_pad = _round_up(D_in, 128)             # lane-dense K for the prologue matmul
    C_pad = _round_up(max(C, 128), 128)      # lane-dense output writeback
    B_pad = _round_up(max(B, 8), 8)          # full sublane group
    B_blk = B_pad if B_pad <= 256 else 256   # per-core/MXU-friendly batch block
    B_pad = _round_up(B_pad, B_blk)
    nb = B_pad // B_blk                      # batch grid (parallel -> 2 TCs on v7x)

    # Time-major + pad batch/features, grouped as (nb, T*B_blk, D_pad) so each
    # grid program's x-projection is ONE contiguous matmul.
    # (Padded rows are garbage but never mix with real rows; sliced off below.)
    x_tbd = jnp.transpose(x_btd, (1, 0, 2))                              # (T, B, D)
    x_tbd = jnp.pad(x_tbd, ((0, 0), (0, B_pad - B), (0, D_pad - D_in)))  # (T, Bp, Dp)
    x_grp = (x_tbd.reshape(T, nb, B_blk, D_pad)
                  .transpose(1, 0, 2, 3)
                  .reshape(nb, T * B_blk, D_pad)
                  .astype(jnp.bfloat16))

    wih_t = jnp.pad(w_ih.T, ((0, D_pad - D_in), (0, 0))).astype(jnp.bfloat16)  # (Dp,H)
    whh_t = w_hh.T.astype(jnp.bfloat16)                                        # (H, H)
    b_comb = (b_ih + b_hh).reshape(1, H).astype(jnp.float32)                   # (1, H)
    wfc_t = jnp.pad(w_fc.T, ((0, 0), (0, C_pad - C))).astype(jnp.bfloat16)     # (H,Cp)
    bfc = jnp.pad(b_fc.reshape(1, C), ((0, 0), (0, C_pad - C))).astype(jnp.float32)

    # Explicit VMEM budget: resident footprint + double-buffered I/O + headroom.
    est = (2 * T * B_blk * D_pad * 2           # x block (bf16), double-buffered
           + T * B_blk * H * 4                 # xw scratch (f32)
           + D_pad * H * 2 + H * H * 2 + H * C_pad * 2 + (H + C_pad) * 4
           + 2 * B_blk * C_pad * 4)            # output block, double-buffered
    vmem_limit = min(2 * est + (4 << 20), 96 << 20)

    out = pl.pallas_call(
        rnn_fc_kernel,
        out_shape=jax.ShapeDtypeStruct((B_pad, C_pad), jnp.float32),
        grid=(nb,),
        in_specs=[
            pl.BlockSpec((None, T * B_blk, D_pad), lambda g: (g, 0, 0)),  # x (per block)
            pl.BlockSpec((D_pad, H), lambda g: (0, 0)),                   # W_ih^T
            pl.BlockSpec((H, H), lambda g: (0, 0)),                       # W_hh^T
            pl.BlockSpec((1, H), lambda g: (0, 0)),                       # b_ih + b_hh
            pl.BlockSpec((H, C_pad), lambda g: (0, 0)),                   # W_fc^T
            pl.BlockSpec((1, C_pad), lambda g: (0, 0)),                   # b_fc
        ],
        out_specs=pl.BlockSpec((B_blk, C_pad), lambda g: (g, 0)),
        scratch_shapes=[pltpu.VMEM((T * B_blk, H), jnp.float32)],
        compiler_params=pltpu.CompilerParams(
            dimension_semantics=("parallel",),
            vmem_limit_bytes=vmem_limit),
    )(x_grp, wih_t, whh_t, b_comb, wfc_t, bfc)

    return out[:B, :C]


def rnn_model_reference(x_btd, w_ih, w_hh, b_ih, b_hh, w_fc, b_fc):
    B, T, _ = x_btd.shape
    H = w_ih.shape[0]
    h = jnp.zeros((B, H), jnp.float32)
    for t in range(T):
        h = jnp.tanh(x_btd[:, t, :] @ w_ih.T + b_ih + h @ w_hh.T + b_hh)
    return h @ w_fc.T + b_fc


if __name__ == "__main__":
    # Small shapes consistent with the module's forward (B, T, input_size).
    B, T, D_in, H, C = 2, 8, 64, 128, 2

    key = jax.random.PRNGKey(0)
    ks = jax.random.split(key, 7)
    bound = 1.0 / (H ** 0.5)          # PyTorch nn.RNN / nn.Linear default init range
    x = jax.random.normal(ks[0], (B, T, D_in), jnp.float32)
    w_ih = jax.random.uniform(ks[1], (H, D_in), jnp.float32, -bound, bound)
    w_hh = jax.random.uniform(ks[2], (H, H), jnp.float32, -bound, bound)
    b_ih = jax.random.uniform(ks[3], (H,), jnp.float32, -bound, bound)
    b_hh = jax.random.uniform(ks[4], (H,), jnp.float32, -bound, bound)
    w_fc = jax.random.uniform(ks[5], (C, H), jnp.float32, -bound, bound)
    b_fc = jax.random.uniform(ks[6], (C,), jnp.float32, -bound, bound)

    out = rnn_model_forward(x, w_ih, w_hh, b_ih, b_hh, w_fc, b_fc)
    out = jax.block_until_ready(out)

    ref = rnn_model_reference(x, w_ih, w_hh, b_ih, b_hh, w_fc, b_fc)
    assert out.shape == (B, C)
    # bf16 matmul inputs (f32 accumulation, incl. bf16 W_hh over T=8 steps and
    # bf16 FC) -> slightly relaxed tolerance vs the f32 reference.
    assert jnp.allclose(out, ref, atol=3e-2, rtol=3e-2), (out, ref)

    print("KERNEL_OK")
</pallas_src>

<mosaic_0001>
module attributes {stable_mosaic.version = 11 : i64} {
  func.func @rnn_fc_kernel(%arg0: i32, %arg1: memref<1x64x128xbf16, #tpu.memory_space<vmem>>, %arg2: memref<128x128xbf16, #tpu.memory_space<vmem>>, %arg3: memref<128x128xbf16, #tpu.memory_space<vmem>>, %arg4: memref<1x128xf32, #tpu.memory_space<vmem>>, %arg5: memref<128x128xbf16, #tpu.memory_space<vmem>>, %arg6: memref<1x128xf32, #tpu.memory_space<vmem>>, %arg7: memref<8x128xf32, #tpu.memory_space<vmem>>, %arg8: memref<64x128xf32, #tpu.memory_space<vmem>>) attributes {dimension_semantics = [#tpu.dimension_semantics<parallel>], iteration_bounds = array<i64: 1>, scalar_prefetch = 0 : i64, scratch_operands = 1 : i64, tpu.core_type = #tpu.core_type<tc>, window_params = [{transform_indices = @transform_0, window_bounds = array<i64: 1, 64, 128>}, {pipeline_mode = #tpu.pipeline_mode<synchronous>, transform_indices = @transform_1, window_bounds = array<i64: 128, 128>}, {pipeline_mode = #tpu.pipeline_mode<synchronous>, transform_indices = @transform_2, window_bounds = array<i64: 128, 128>}, {pipeline_mode = #tpu.pipeline_mode<synchronous>, transform_indices = @transform_3, window_bounds = array<i64: 1, 128>}, {pipeline_mode = #tpu.pipeline_mode<synchronous>, transform_indices = @transform_4, window_bounds = array<i64: 128, 128>}, {pipeline_mode = #tpu.pipeline_mode<synchronous>, transform_indices = @transform_5, window_bounds = array<i64: 1, 128>}, {transform_indices = @transform_6, window_bounds = array<i64: 8, 128>}]} {
    %c0 = arith.constant 0 : index
    %c0_0 = arith.constant 0 : index
    %c0_1 = arith.constant 0 : index
    %0 = vector.load %arg1[%c0, %c0_0, %c0_1] : memref<1x64x128xbf16, #tpu.memory_space<vmem>>, vector<1x64x128xbf16>
    %1 = vector.shape_cast %0 : vector<1x64x128xbf16> to vector<64x128xbf16>
    %c0_2 = arith.constant 0 : index
    %c0_3 = arith.constant 0 : index
    %2 = vector.load %arg2[%c0_2, %c0_3] : memref<128x128xbf16, #tpu.memory_space<vmem>>, vector<128x128xbf16>
    %cst = arith.constant dense<0.000000e+00> : vector<64x128xf32>
    %3 = tpu.matmul %1, %2, %cst {dimension_numbers = #tpu.dot_dimension_numbers<[1], [0], [0], [1], [0, 0, 1, 1], [], []>} : vector<64x128xbf16>, vector<128x128xbf16>, vector<64x128xf32> -> vector<64x128xf32>
    %c0_4 = arith.constant 0 : index
    %c0_5 = arith.constant 0 : index
    %4 = vector.load %arg4[%c0_4, %c0_5] : memref<1x128xf32, #tpu.memory_space<vmem>>, vector<1x128xf32>
    %5 = vector.broadcast %4 : vector<1x128xf32> to vector<64x128xf32>
    %6 = arith.addf %3, %5 : vector<64x128xf32>
    %c0_6 = arith.constant 0 : index
    %c0_7 = arith.constant 0 : index
    %7 = vector.load %arg8[%c0_6, %c0_7] : memref<64x128xf32, #tpu.memory_space<vmem>>, vector<64x128xf32>
    tpu.vector_store %arg8[%c0_6, %c0_7], %6 {strides = array<i32>} : memref<64x128xf32, #tpu.memory_space<vmem>>, vector<64x128xf32>,
    %c0_8 = arith.constant 0 : index
    %c0_9 = arith.constant 0 : index
    %8 = vector.load %arg3[%c0_8, %c0_9] : memref<128x128xbf16, #tpu.memory_space<vmem>>, vector<128x128xbf16>
    %cst_10 = arith.constant 0.000000e+00 : f32
    %9 = vector.broadcast %cst_10 : f32 to vector<8x128xf32>
    %c0_i32 = arith.constant 0 : i32
    %c8_i32 = arith.constant 8 : i32
    %10 = arith.muli %c0_i32, %c8_i32 : i32
    %11 = tpu.assume_multiple %10, 8 : i32
    %12 = arith.index_cast %11 : i32 to index
    %c0_11 = arith.constant 0 : index
    %13 = vector.load %arg8[%12, %c0_11] : memref<64x128xf32, #tpu.memory_space<vmem>>, vector<8x128xf32>
    %14 = arith.truncf %9 : vector<8x128xf32> to vector<8x128xbf16>
    %cst_12 = arith.constant dense<0.000000e+00> : vector<8x128xf32>
    %15 = tpu.matmul %14, %8, %cst_12 {dimension_numbers = #tpu.dot_dimension_numbers<[1], [0], [0], [1], [0, 0, 1, 1], [], []>} : vector<8x128xbf16>, vector<128x128xbf16>, vector<8x128xf32> -> vector<8x128xf32>
    %16 = arith.addf %13, %15 : vector<8x128xf32>
    %17 = math.tanh %16 : vector<8x128xf32>
    %c1_i32 = arith.constant 1 : i32
    %c8_i32_13 = arith.constant 8 : i32
    %18 = arith.muli %c1_i32, %c8_i32_13 : i32
    %19 = tpu.assume_multiple %18, 8 : i32
    %20 = arith.index_cast %19 : i32 to index
    %c0_14 = arith.constant 0 : index
    %21 = vector.load %arg8[%20, %c0_14] : memref<64x128xf32, #tpu.memory_space<vmem>>, vector<8x128xf32>
    %22 = arith.truncf %17 : vector<8x128xf32> to vector<8x128xbf16>
    %cst_15 = arith.constant dense<0.000000e+00> : vector<8x128xf32>
    %23 = tpu.matmul %22, %8, %cst_15 {dimension_numbers = #tpu.dot_dimension_numbers<[1], [0], [0], [1], [0, 0, 1, 1], [], []>} : vector<8x128xbf16>, vector<128x128xbf16>, vector<8x128xf32> -> vector<8x128xf32>
    %24 = arith.addf %21, %23 : vector<8x128xf32>
    %25 = math.tanh %24 : vector<8x128xf32>
    %c2_i32 = arith.constant 2 : i32
    %c8_i32_16 = arith.constant 8 : i32
    %26 = arith.muli %c2_i32, %c8_i32_16 : i32
    %27 = tpu.assume_multiple %26, 8 : i32
    %28 = arith.index_cast %27 : i32 to index
    %c0_17 = arith.constant 0 : index
    %29 = vector.load %arg8[%28, %c0_17] : memref<64x128xf32, #tpu.memory_space<vmem>>, vector<8x128xf32>
    %30 = arith.truncf %25 : vector<8x128xf32> to vector<8x128xbf16>
    %cst_18 = arith.constant dense<0.000000e+00> : vector<8x128xf32>
    %31 = tpu.matmul %30, %8, %cst_18 {dimension_numbers = #tpu.dot_dimension_numbers<[1], [0], [0], [1], [0, 0, 1, 1], [], []>} : vector<8x128xbf16>, vector<128x128xbf16>, vector<8x128xf32> -> vector<8x128xf32>
    %32 = arith.addf %29, %31 : vector<8x128xf32>
    %33 = math.tanh %32 : vector<8x128xf32>
    %c3_i32 = arith.constant 3 : i32
    %c8_i32_19 = arith.constant 8 : i32
    %34 = arith.muli %c3_i32, %c8_i32_19 : i32
    %35 = tpu.assume_multiple %34, 8 : i32
    %36 = arith.index_cast %35 : i32 to index
    %c0_20 = arith.constant 0 : index
    %37 = vector.load %arg8[%36, %c0_20] : memref<64x128xf32, #tpu.memory_space<vmem>>, vector<8x128xf32>
    %38 = arith.truncf %33 : vector<8x128xf32> to vector<8x128xbf16>
    %cst_21 = arith.constant dense<0.000000e+00> : vector<8x128xf32>
    %39 = tpu.matmul %38, %8, %cst_21 {dimension_numbers = #tpu.dot_dimension_numbers<[1], [0], [0], [1], [0, 0, 1, 1], [], []>} : vector<8x128xbf16>, vector<128x128xbf16>, vector<8x128xf32> -> vector<8x128xf32>
    %40 = arith.addf %37, %39 : vector<8x128xf32>
    %41 = math.tanh %40 : vector<8x128xf32>
    %c4_i32 = arith.constant 4 : i32
    %c8_i32_22 = arith.constant 8 : i32
    %42 = arith.muli %c4_i32, %c8_i32_22 : i32
    %43 = tpu.assume_multiple %42, 8 : i32
    %44 = arith.index_cast %43 : i32 to index
    %c0_23 = arith.constant 0 : index
    %45 = vector.load %arg8[%44, %c0_23] : memref<64x128xf32, #tpu.memory_space<vmem>>, vector<8x128xf32>
    %46 = arith.truncf %41 : vector<8x128xf32> to vector<8x128xbf16>
    %cst_24 = arith.constant dense<0.000000e+00> : vector<8x128xf32>
    %47 = tpu.matmul %46, %8, %cst_24 {dimension_numbers = #tpu.dot_dimension_numbers<[1], [0], [0], [1], [0, 0, 1, 1], [], []>} : vector<8x128xbf16>, vector<128x128xbf16>, vector<8x128xf32> -> vector<8x128xf32>
    %48 = arith.addf %45, %47 : vector<8x128xf32>
    %49 = math.tanh %48 : vector<8x128xf32>
    %c5_i32 = arith.constant 5 : i32
    %c8_i32_25 = arith.constant 8 : i32
    %50 = arith.muli %c5_i32, %c8_i32_25 : i32
    %51 = tpu.assume_multiple %50, 8 : i32
    %52 = arith.index_cast %51 : i32 to index
    %c0_26 = arith.constant 0 : index
    %53 = vector.load %arg8[%52, %c0_26] : memref<64x128xf32, #tpu.memory_space<vmem>>, vector<8x128xf32>
    %54 = arith.truncf %49 : vector<8x128xf32> to vector<8x128xbf16>
    %cst_27 = arith.constant dense<0.000000e+00> : vector<8x128xf32>
    %55 = tpu.matmul %54, %8, %cst_27 {dimension_numbers = #tpu.dot_dimension_numbers<[1], [0], [0], [1], [0, 0, 1, 1], [], []>} : vector<8x128xbf16>, vector<128x128xbf16>, vector<8x128xf32> -> vector<8x128xf32>
    %56 = arith.addf %53, %55 : vector<8x128xf32>
    %57 = math.tanh %56 : vector<8x128xf32>
    %c6_i32 = arith.constant 6 : i32
    %c8_i32_28 = arith.constant 8 : i32
    %58 = arith.muli %c6_i32, %c8_i32_28 : i32
    %59 = tpu.assume_multiple %58, 8 : i32
    %60 = arith.index_cast %59 : i32 to index
    %c0_29 = arith.constant 0 : index
    %61 = vector.load %arg8[%60, %c0_29] : memref<64x128xf32, #tpu.memory_space<vmem>>, vector<8x128xf32>
    %62 = arith.truncf %57 : vector<8x128xf32> to vector<8x128xbf16>
    %cst_30 = arith.constant dense<0.000000e+00> : vector<8x128xf32>
    %63 = tpu.matmul %62, %8, %cst_30 {dimension_numbers = #tpu.dot_dimension_numbers<[1], [0], [0], [1], [0, 0, 1, 1], [], []>} : vector<8x128xbf16>, vector<128x128xbf16>, vector<8x128xf32> -> vector<8x128xf32>
    %64 = arith.addf %61, %63 : vector<8x128xf32>
    %65 = math.tanh %64 : vector<8x128xf32>
    %c7_i32 = arith.constant 7 : i32
    %c8_i32_31 = arith.constant 8 : i32
    %66 = arith.muli %c7_i32, %c8_i32_31 : i32
    %67 = tpu.assume_multiple %66, 8 : i32
    %68 = arith.index_cast %67 : i32 to index
    %c0_32 = arith.constant 0 : index
    %69 = vector.load %arg8[%68, %c0_32] : memref<64x128xf32, #tpu.memory_space<vmem>>, vector<8x128xf32>
    %70 = arith.truncf %65 : vector<8x128xf32> to vector<8x128xbf16>
    %cst_33 = arith.constant dense<0.000000e+00> : vector<8x128xf32>
    %71 = tpu.matmul %70, %8, %cst_33 {dimension_numbers = #tpu.dot_dimension_numbers<[1], [0], [0], [1], [0, 0, 1, 1], [], []>} : vector<8x128xbf16>, vector<128x128xbf16>, vector<8x128xf32> -> vector<8x128xf32>
    %72 = arith.addf %69, %71 : vector<8x128xf32>
    %73 = math.tanh %72 : vector<8x128xf32>
    %c8_i32_34 = arith.constant 8 : i32
    %74 = arith.truncf %73 : vector<8x128xf32> to vector<8x128xbf16>
    %c0_35 = arith.constant 0 : index
    %c0_36 = arith.constant 0 : index
    %75 = vector.load %arg5[%c0_35, %c0_36] : memref<128x128xbf16, #tpu.memory_space<vmem>>, vector<128x128xbf16>
    %cst_37 = arith.constant dense<0.000000e+00> : vector<8x128xf32>
    %76 = tpu.matmul %74, %75, %cst_37 {dimension_numbers = #tpu.dot_dimension_numbers<[1], [0], [0], [1], [0, 0, 1, 1], [], []>} : vector<8x128xbf16>, vector<128x128xbf16>, vector<8x128xf32> -> vector<8x128xf32>
    %c0_38 = arith.constant 0 : index
    %c0_39 = arith.constant 0 : index
    %77 = vector.load %arg6[%c0_38, %c0_39] : memref<1x128xf32, #tpu.memory_space<vmem>>, vector<1x128xf32>
    %78 = vector.broadcast %77 : vector<1x128xf32> to vector<8x128xf32>
    %79 = arith.addf %76, %78 : vector<8x128xf32>
    %c0_40 = arith.constant 0 : index
    %c0_41 = arith.constant 0 : index
    %80 = vector.load %arg7[%c0_40, %c0_41] : memref<8x128xf32, #tpu.memory_space<vmem>>, vector<8x128xf32>
    tpu.vector_store %arg7[%c0_40, %c0_41], %79 {strides = array<i32>} : memref<8x128xf32, #tpu.memory_space<vmem>>, vector<8x128xf32>,
    return
  }
  func.func @transform_0(%arg0: i32) -> (i32, i32, i32) {
    %c0_i32 = arith.constant 0 : i32
    %c0_i32_0 = arith.constant 0 : i32
    %c0_i32_1 = arith.constant 0 : i32
    return %arg0, %c0_i32, %c0_i32_0 : i32, i32, i32
  }
  func.func @transform_1(%arg0: i32) -> (i32, i32) {
    %c0_i32 = arith.constant 0 : i32
    %c0_i32_0 = arith.constant 0 : i32
    %c0_i32_1 = arith.constant 0 : i32
    return %c0_i32, %c0_i32_0 : i32, i32
  }
  func.func @transform_2(%arg0: i32) -> (i32, i32) {
    %c0_i32 = arith.constant 0 : i32
    %c0_i32_0 = arith.constant 0 : i32
    %c0_i32_1 = arith.constant 0 : i32
    return %c0_i32, %c0_i32_0 : i32, i32
  }
  func.func @transform_3(%arg0: i32) -> (i32, i32) {
    %c0_i32 = arith.constant 0 : i32
    %c0_i32_0 = arith.constant 0 : i32
    %c0_i32_1 = arith.constant 0 : i32
    return %c0_i32, %c0_i32_0 : i32, i32
  }
  func.func @transform_4(%arg0: i32) -> (i32, i32) {
    %c0_i32 = arith.constant 0 : i32
    %c0_i32_0 = arith.constant 0 : i32
    %c0_i32_1 = arith.constant 0 : i32
    return %c0_i32, %c0_i32_0 : i32, i32
  }
  func.func @transform_5(%arg0: i32) -> (i32, i32) {
    %c0_i32 = arith.constant 0 : i32
    %c0_i32_0 = arith.constant 0 : i32
    %c0_i32_1 = arith.constant 0 : i32
    return %c0_i32, %c0_i32_0 : i32, i32
  }
  func.func @transform_6(%arg0: i32) -> (i32, i32) {
    %c0_i32 = arith.constant 0 : i32
    %c0_i32_0 = arith.constant 0 : i32
    return %arg0, %c0_i32 : i32, i32
  }
}

</mosaic_0001>

<bundles_post_ra>
// kernel: tpu_custom_call.1
= control target key start
LH: loop header
LB: loop body
LE: loop exit
PB: predicated region body
PF: predicated region fallthrough
CT: control target
= control target key end

     0   :  { %11 = vsyncpa [#allocation4], 0  ;;  %s951_s0 = inlined_call_operand.hbm [shape: bf16[1,64,128], index: 0, kind: input, shape index: {}]   ;;  %s952_s1 = inlined_call_operand.hbm [shape: bf16[128,128], index: 1, kind: input, shape index: {}]   ;;  %s953_s2 = inlined_call_operand.hbm [shape: bf16[128,128], index: 2, kind: input, shape index: {}]   ;;  %s954_s3 = inlined_call_operand.vmem [shape: f32[1,128], index: 3, kind: input, shape index: {}]   ;;  %s955_s4 = inlined_call_operand.hbm [shape: bf16[128,128], index: 4, kind: input, shape index: {}]   ;;  %s956_s5 = inlined_call_operand.vmem [shape: f32[1,128], index: 5, kind: input, shape index: {}]   ;;  %s957_s6 = inlined_call_operand.hbm [shape: f32[8,128], index: 6, kind: output, shape index: {}]  }
   0x1   :  { %12 = vsyncpa [#allocation7], 0 }
   0x2   :  { %13 = vsyncpa [#allocation10], 0 }
   0x3   :  { %14 = vsyncpa [#allocation5], 0  ;;  %s32_s23 = sshll.u32 %s952_s1, 4  ;;  %s827_s24 = smov [#allocation6]   ;;  %s33_s23 = int_to_ptr.hbm [resolvable:$true] %s32_s23 }
   0x4   :  { %s34_s25 = sshll.u32 %s827_s24, 4  ;;  %s19_s28 = sshll.u32 %s951_s0, 4  ;;  %s35_s25 = int_to_ptr.vmem [resolvable:$true] %s34_s25  ;;  %s20_s28 = int_to_ptr.hbm [resolvable:$true] %s19_s28 }
   0x5   :  { %s828_s29 = smov 64   ;;  %s829_s30 = smov 4  }
   0x6   :  { %40 = dma.hbm_to_vmem [thread:$0]  %s33_s23, 1024, %s35_s25, [#allocation7], %s828_s29, %s828_s29, %s829_s30  }
   0x7   :  { %s830_s7 = smov [#allocation3]   ;;  %s45_s11 = sshll.u32 %s953_s2, 4  ;;  %s46_s11 = int_to_ptr.hbm [resolvable:$true] %s45_s11 }
   0x8   :  { %s21_s8 = sshll.u32 %s830_s7, 4  ;;  %s60_s13 = sshll.u32 %s955_s4, 4  ;;  %s22_s8 = int_to_ptr.vmem [resolvable:$true] %s21_s8  ;;  %s61_s13 = int_to_ptr.hbm [resolvable:$true] %s60_s13 }
   0x9   :  { %27 = dma.hbm_to_vmem [thread:$0]  %s20_s28, 512, %s22_s8, [#allocation4], %s828_s29, %s828_s29, %s829_s30  }
   0xa   :  { %s831_s14 = smov [#allocation8]   ;;  %s832_s0 = smov [#allocation9]  }
   0xb   :  { %s47_s15 = sshll.u32 %s831_s14, 4  ;;  %s62_s16 = sshll.u32 %s832_s0, 4  ;;  %s48_s15 = int_to_ptr.vmem [resolvable:$true] %s47_s15  ;;  %s63_s16 = int_to_ptr.vmem [resolvable:$true] %s62_s16 }
   0xc   :  { %53 = dma.hbm_to_vmem [thread:$0]  %s46_s11, 1024, %s48_s15, [#allocation7], %s828_s29, %s828_s29, %s829_s30  }
   0xd   :  { %68 = dma.hbm_to_vmem [thread:$0]  %s61_s13, 1024, %s63_s16, [#allocation10], %s828_s29, %s828_s29, %s829_s30  }
   0xe   :  { %819 = dma.done.wait [#allocation4], 512  }
   0xf   :  { %820 = vsyncadd [#allocation4], 4294966784 }
  0x10   :  { %821 = dma.done.wait [#allocation7], 2048  }
  0x11   :  { %822 = vsyncadd [#allocation7], 4294965248 }
  0x12   :  { %823 = dma.done.wait [#allocation10], 1024  }
  0x13   :  { %824 = vsyncadd [#allocation10], 4294966272  ;;  %v656_v0 = vld [vmem:[#allocation6 + $0x38] sm:$0xff]  ;;  %v655_v2 = vld [vmem:[#allocation6 + $0x30] sm:$0xff]  ;;  %v833_v17 = vmov 0   ;;  %s834_s18 = smov [#allocation11]  }
  0x14   :  { %v882_v1 = vld [vmem:[#allocation8 + $0x38] sm:$0xff]  ;;  %188 = vmatpush.bf16.msra.mxu0 %v656_v0  ;;  %v885_v3 = vld [vmem:[#allocation8 + $0x30] sm:$0xff]  ;;  %v654_v4 = vld [vmem:[#allocation6 + $0x28] sm:$0xff]  ;;  %s519_s19 = sshll.u32 %s834_s18, 4  ;;  %s521_s22 = sshll.u32 %s957_s6, 4  ;;  %s520_s19 = int_to_ptr.vmem [resolvable:$true] %s519_s19  ;;  %s522_s22 = int_to_ptr.hbm [resolvable:$true] %s521_s22 }
  0x15   :  { %290 = vmatpush.bf16.msra.mxu1 %v882_v1  ;;  %308 = vmatpush.bf16.msra.mxu2 %v882_v1  ;;  %v890_v5 = vld [vmem:[#allocation8 + $0x28] sm:$0xff]  ;;  %v653_v6 = vld [vmem:[#allocation6 + $0x20] sm:$0xff]  ;;  %v652_v8 = vld [vmem:[#allocation6 + $0x18] sm:$0xff] }
  0x16   :  { %326 = vmatpush.bf16.msra.mxu3 %v882_v1  ;;  %v895_v7 = vld [vmem:[#allocation8 + $0x20] sm:$0xff]  ;;  %v900_v9 = vld [vmem:[#allocation8 + $0x18] sm:$0xff]  ;;  %v651_v10 = vld [vmem:[#allocation6 + $0x10] sm:$0xff] }
  0x17   :  { %v659_v11 = vld [vmem:[#allocation8 + $0x10] sm:$0xff]  ;;  %v650_v12 = vld [vmem:[#allocation6 + $0x8] sm:$0xff]  ;;  %v649_v14 = vld [vmem:[#allocation6] sm:$0xff] }
  0x18   :  { %189 = vmatpush.bf16.msra.mxu0 %v655_v2  ;;  %v658_v13 = vld [vmem:[#allocation8 + $0x8] sm:$0xff]  ;;  %v657_v15 = vld [vmem:[#allocation8] sm:$0xff]  ;;  %v647_v41 = vld [vmem:[#allocation3 + $0x10] sm:$0xff] }
  0x19   :  { %291 = vmatpush.bf16.msra.mxu1 %v885_v3  ;;  %309 = vmatpush.bf16.msra.mxu2 %v885_v3  ;;  %v645_v16 = vld [vmem:[#allocation3] sm:$0xff]  ;;  %v646_v26 = vld [vmem:[#allocation3 + $0x8] sm:$0xff]  ;;  %v648_v49 = vld [vmem:[#allocation3 + $0x18] sm:$0xff] }
  0x1a   :  { %327 = vmatpush.bf16.msra.mxu3 %v885_v3  ;;  %v935_v18 = vld [vmem:[%s954_s3] ss:$0 sm:$0xff]  ;;  %v672_v0 = vld [vmem:[#allocation9 + $0x38] sm:$0xff]  ;;  %v671_v2 = vld [vmem:[#allocation9 + $0x30] sm:$0xff] }
  0x1c   :  { %190 = vmatpush.bf16.msra.mxu0 %v654_v4  ;;  %v669_v4 = vld [vmem:[#allocation9 + $0x20] sm:$0xff] }
  0x1d   :  { %292 = vmatpush.bf16.msra.mxu1 %v890_v5  ;;  %310 = vmatpush.bf16.msra.mxu2 %v890_v5 }
  0x1e   :  { %328 = vmatpush.bf16.msra.mxu3 %v890_v5 }
  0x20   :  { %191 = vmatpush.bf16.msra.mxu0 %v653_v6  ;;  %v668_v6 = vld [vmem:[#allocation9 + $0x18] sm:$0xff] }
  0x21   :  { %293 = vmatpush.bf16.msra.mxu1 %v895_v7  ;;  %311 = vmatpush.bf16.msra.mxu2 %v895_v7 }
  0x22   :  { %329 = vmatpush.bf16.msra.mxu3 %v895_v7 }
  0x24   :  { %192 = vmatpush.bf16.msra.mxu0 %v652_v8 }
  0x25   :  { %294 = vmatpush.bf16.msra.mxu1 %v900_v9  ;;  %312 = vmatpush.bf16.msra.mxu2 %v900_v9 }
  0x26   :  { %330 = vmatpush.bf16.msra.mxu3 %v900_v9 }
  0x28   :  { %193 = vmatpush.bf16.msra.mxu0 %v651_v10 }
  0x29   :  { %295 = vmatpush.bf16.msra.mxu1 %v659_v11  ;;  %313 = vmatpush.bf16.msra.mxu2 %v659_v11 }
  0x2a   :  { %331 = vmatpush.bf16.msra.mxu3 %v659_v11 }
  0x2c   :  { %194 = vmatpush.bf16.msra.mxu0 %v650_v12 }
  0x2d   :  { %296 = vmatpush.bf16.msra.mxu1 %v658_v13  ;;  %314 = vmatpush.bf16.msra.mxu2 %v658_v13 }
  0x2e   :  { %332 = vmatpush.bf16.msra.mxu3 %v658_v13 }
  0x30   :  { %195 = vmatpush.bf16.msra.mxu0 %v649_v14  ;;  %v666_v14 = vld [vmem:[#allocation9 + $0x8] sm:$0xff] }
  0x31   :  { %297 = vmatpush.bf16.msra.mxu1 %v657_v15  ;;  %315 = vmatpush.bf16.msra.mxu2 %v657_v15 }
  0x32   :  { %333 = vmatpush.bf16.msra.mxu3 %v657_v15 }
  0x33   :  { %196 = vmatmul.bf16.vlgmr.msra.gmra.mxu0 %v645_v16 }
  0x34   :  { %298 = vmatmul.bf16.vlgmr.msra.gmra.mxu1 %v833_v17  ;;  %398 = vmatpush.bf16.msrb.mxu0 %v882_v1 }
  0x35   :  { %344 = vmatpush.bf16.msrb.mxu1 %v882_v1  ;;  %362 = vmatpush.bf16.msrb.mxu2 %v882_v1 }
  0x36   :  { %380 = vmatpush.bf16.msrb.mxu3 %v882_v1 }
  0x38   :  { %399 = vmatpush.bf16.msrb.mxu0 %v885_v3 }
  0x39   :  { %345 = vmatpush.bf16.msrb.mxu1 %v885_v3  ;;  %363 = vmatpush.bf16.msrb.mxu2 %v885_v3 }
  0x3a   :  { %381 = vmatpush.bf16.msrb.mxu3 %v885_v3 }
  0x3c   :  { %400 = vmatpush.bf16.msrb.mxu0 %v890_v5 }
  0x3d   :  { %346 = vmatpush.bf16.msrb.mxu1 %v890_v5  ;;  %364 = vmatpush.bf16.msrb.mxu2 %v890_v5 }
  0x3e   :  { %382 = vmatpush.bf16.msrb.mxu3 %v890_v5 }
  0x40   :  { %401 = vmatpush.bf16.msrb.mxu0 %v895_v7 }
  0x41   :  { %347 = vmatpush.bf16.msrb.mxu1 %v895_v7  ;;  %365 = vmatpush.bf16.msrb.mxu2 %v895_v7 }
  0x42   :  { %383 = vmatpush.bf16.msrb.mxu3 %v895_v7 }
  0x43   :  { %201 = vmatmul.bf16.gmra.mxu0 %v646_v26 }
  0x44   :  { %402 = vmatpush.bf16.msrb.mxu0 %v900_v9 }
  0x45   :  { %348 = vmatpush.bf16.msrb.mxu1 %v900_v9  ;;  %366 = vmatpush.bf16.msrb.mxu2 %v900_v9 }
  0x46   :  { %384 = vmatpush.bf16.msrb.mxu3 %v900_v9 }
  0x48   :  { %403 = vmatpush.bf16.msrb.mxu0 %v659_v11 }
  0x49   :  { %349 = vmatpush.bf16.msrb.mxu1 %v659_v11  ;;  %367 = vmatpush.bf16.msrb.mxu2 %v659_v11 }
  0x4a   :  { %385 = vmatpush.bf16.msrb.mxu3 %v659_v11 }
  0x4c   :  { %404 = vmatpush.bf16.msrb.mxu0 %v658_v13 }
  0x4d   :  { %350 = vmatpush.bf16.msrb.mxu1 %v658_v13  ;;  %368 = vmatpush.bf16.msrb.mxu2 %v658_v13 }
  0x4e   :  { %386 = vmatpush.bf16.msrb.mxu3 %v658_v13 }
  0x50   :  { %405 = vmatpush.bf16.msrb.mxu0 %v657_v15 }
  0x51   :  { %351 = vmatpush.bf16.msrb.mxu1 %v657_v15  ;;  %369 = vmatpush.bf16.msrb.mxu2 %v657_v15 }
  0x52   :  { %387 = vmatpush.bf16.msrb.mxu3 %v657_v15 }
  0x53   :  { %206 = vmatmul.bf16.gmra.mxu0 %v647_v41 }
  0x55   :  { %416 = vmatpush.bf16.msra.mxu1 %v882_v1 }
  0x59   :  { %417 = vmatpush.bf16.msra.mxu1 %v885_v3  ;;  %v670_v3 = vld [vmem:[#allocation9 + $0x28] sm:$0xff] }
  0x5d   :  { %418 = vmatpush.bf16.msra.mxu1 %v890_v5 }
  0x61   :  { %419 = vmatpush.bf16.msra.mxu1 %v895_v7 }
  0x63   :  { %211 = vmatmul.bf16.gmra.mxu0 %v648_v49 }
  0x65   :  { %420 = vmatpush.bf16.msra.mxu1 %v900_v9 }
  0x69   :  { %421 = vmatpush.bf16.msra.mxu1 %v659_v11 }
  0x6d   :  { %422 = vmatpush.bf16.msra.mxu1 %v658_v13  ;;  %v667_v13 = vld [vmem:[#allocation9 + $0x10] sm:$0xff] }
  0x71   :  { %423 = vmatpush.bf16.msra.mxu1 %v657_v15  ;;  %v665_v15 = vld [vmem:[#allocation9] sm:$0xff] }
  0xb0   :  { %v197_v19 = vpop.f32.mrf.mxu0 }
  0xb1   :  { %v299_v20 = vpop.f32.mrf.mxu1  ;;  %v198_v21 = vadd.f32 %v935_v18, %v197_v19 }
  0xb3   :  { %v303_v22 = vadd.f32 %v299_v20, %v198_v21 }
  0xb5   :  { %683 = vtanh.f32 %v303_v22 }
  0xb8   :  { %v199_v27 = vpop.f32.mrf.mxu0 }
  0xb9   :  { %v301_v23 = vpop.f32.mrf.mxu1  ;;  %v200_v28 = vadd.f32 %v935_v18, %v199_v27 }
  0xba   :  { %v682_v23 = vld [vmem:[%s956_s5] ss:$0 sm:$0xff] }
  0xbb   :  { %v684_v24 = vpop.eup %683 }
  0xbc   :  { %v307_v25 = vpack.c.bf16 %v684_v24, %v684_v24 }
  0xbe   :  { %316 = vmatmul.bf16.vlgmr.msra.gmra.mxu2 %v307_v25 }
  0xbf   :  { %500 = vmatpush.bf16.msra.mxu2 %v672_v0 }
  0xc0   :  { %v202_v34 = vpop.f32.mrf.mxu0 }
  0xc1   :  { %v203_v35 = vadd.f32 %v935_v18, %v202_v34 }
  0xc3   :  { %501 = vmatpush.bf16.msra.mxu2 %v671_v2 }
  0xc7   :  { %502 = vmatpush.bf16.msra.mxu2 %v670_v3 }
  0xc8   :  { %v204_v42 = vpop.f32.mrf.mxu0 }
  0xc9   :  { %v205_v43 = vadd.f32 %v935_v18, %v204_v42 }
  0xcb   :  { %503 = vmatpush.bf16.msra.mxu2 %v669_v4 }
  0xcf   :  { %504 = vmatpush.bf16.msra.mxu2 %v668_v6 }
  0xd0   :  { %v207_v50 = vpop.f32.mrf.mxu0 }
  0xd1   :  { %v208_v51 = vadd.f32 %v935_v18, %v207_v50 }
  0xd3   :  { %505 = vmatpush.bf16.msra.mxu2 %v667_v13 }
  0xd7   :  { %506 = vmatpush.bf16.msra.mxu2 %v666_v14 }
  0xd8   :  { %v209_v57 = vpop.f32.mrf.mxu0 }
  0xd9   :  { %v210_v58 = vadd.f32 %v935_v18, %v209_v57 }
  0xdb   :  { %507 = vmatpush.bf16.msra.mxu2 %v665_v15 }
  0xe0   :  { %v212_v1 = vpop.f32.mrf.mxu0 }
  0xe1   :  { %v213_v7 = vadd.f32 %v935_v18, %v212_v1 }
  0xe8   :  { %v214_v5 = vpop.f32.mrf.mxu0 }
  0xe9   :  { %v215_v16 = vadd.f32 %v935_v18, %v214_v5 }
 0x141   :  { %v317_v29 = vpop.f32.mrf.mxu2 }
 0x142   :  { %v321_v30 = vadd.f32 %v317_v29, %v200_v28 }
 0x144   :  { %685 = vtanh.f32 %v321_v30 }
 0x149   :  { %v319_v31 = vpop.f32.mrf.mxu2 }
 0x14a   :  { %v686_v32 = vpop.eup %685 }
 0x14b   :  { %v325_v33 = vpack.c.bf16 %v686_v32, %v686_v32 }
 0x14d   :  { %334 = vmatmul.bf16.vlgmr.msra.gmra.mxu3 %v325_v33 }
 0x1d0   :  { %v335_v36 = vpop.f32.mrf.mxu3 }
 0x1d1   :  { %v339_v37 = vadd.f32 %v335_v36, %v203_v35 }
 0x1d3   :  { %687 = vtanh.f32 %v339_v37 }
 0x1d8   :  { %v337_v38 = vpop.f32.mrf.mxu3 }
 0x1d9   :  { %v688_v39 = vpop.eup %687 }
 0x1da   :  { %v343_v40 = vpack.c.bf16 %v688_v39, %v688_v39 }
 0x1dc   :  { %352 = vmatmul.bf16.vlgmr.msrb.gmra.mxu1 %v343_v40 }
 0x259   :  { %v353_v44 = vpop.f32.mrf.mxu1 }
 0x25a   :  { %v357_v45 = vadd.f32 %v353_v44, %v205_v43 }
 0x25c   :  { %689 = vtanh.f32 %v357_v45 }
 0x261   :  { %v355_v46 = vpop.f32.mrf.mxu1 }
 0x262   :  { %v690_v47 = vpop.eup %689 }
 0x263   :  { %v361_v48 = vpack.c.bf16 %v690_v47, %v690_v47 }
 0x265   :  { %370 = vmatmul.bf16.vlgmr.msrb.gmra.mxu2 %v361_v48 }
 0x2e8   :  { %v371_v52 = vpop.f32.mrf.mxu2 }
 0x2e9   :  { %v375_v53 = vadd.f32 %v371_v52, %v208_v51 }
 0x2eb   :  { %691 = vtanh.f32 %v375_v53 }
 0x2f0   :  { %v373_v54 = vpop.f32.mrf.mxu2 }
 0x2f1   :  { %v692_v55 = vpop.eup %691 }
 0x2f2   :  { %v379_v56 = vpack.c.bf16 %v692_v55, %v692_v55 }
 0x2f4   :  { %388 = vmatmul.bf16.vlgmr.msrb.gmra.mxu3 %v379_v56 }
 0x377   :  { %v389_v59 = vpop.f32.mrf.mxu3 }
 0x378   :  { %v393_v60 = vadd.f32 %v389_v59, %v210_v58 }
 0x37a   :  { %693 = vtanh.f32 %v393_v60 }
 0x37f   :  { %v391_v61 = vpop.f32.mrf.mxu3 }
 0x380   :  { %v694_v62 = vpop.eup %693 }
 0x381   :  { %v397_v63 = vpack.c.bf16 %v694_v62, %v694_v62 }
 0x383   :  { %406 = vmatmul.bf16.vlgmr.msrb.gmra.mxu0 %v397_v63 }
 0x400   :  { %v407_v8 = vpop.f32.mrf.mxu0 }
 0x401   :  { %v411_v9 = vadd.f32 %v407_v8, %v213_v7 }
 0x403   :  { %695 = vtanh.f32 %v411_v9 }
 0x408   :  { %v409_v10 = vpop.f32.mrf.mxu0 }
 0x409   :  { %v696_v11 = vpop.eup %695 }
 0x40a   :  { %v415_v12 = vpack.c.bf16 %v696_v11, %v696_v11 }
 0x40c   :  { %424 = vmatmul.bf16.vlgmr.msra.gmra.mxu1 %v415_v12 }
 0x489   :  { %v425_v17 = vpop.f32.mrf.mxu1 }
 0x48a   :  { %v429_v19 = vadd.f32 %v425_v17, %v215_v16 }
 0x48c   :  { %697 = vtanh.f32 %v429_v19 }
 0x491   :  { %v427_v20 = vpop.f32.mrf.mxu1 }
 0x492   :  { %v698_v21 = vpop.eup %697 }
 0x493   :  { %v431_v22 = vpack.c.bf16 %v698_v21, %v698_v21 }
 0x495   :  { %508 = vmatmul.bf16.vlgmr.msra.gmra.mxu2 %v431_v22 }
 0x518   :  { %v509_v24 = vpop.f32.mrf.mxu2 }
 0x519   :  { %v510_v25 = vadd.f32 %v682_v23, %v509_v24 }
 0x51b   :  { %513 = vst [vmem:[#allocation11] sm:$0xff] %v510_v25 }
 0x51c   :  { %524 = dma.vmem_to_hbm [thread:$0]  %s520_s19, 128, %s522_s22, [#allocation5]  }
 0x520   :  { %v511_v18 = vpop.f32.mrf.mxu2 }
 0x521   :  { %825 = dma.done.wait [#allocation5], 128  }
 0x522   :  { %826 = vsyncadd [#allocation5], 4294967168 }
 0x523   :  { %529 = vsyncpa [#allocation4], 1 }
 0x524   :  { %530 = vsyncpa [#allocation7], 1 }
 0x525   :  { %531 = vsyncpa [#allocation10], 1 }
 0x526   :  { %532 = vsyncpa [#allocation5], 1 }

</bundles_post_ra>
